<compile_context>
chip_gen: v7x
topology: tpu7x:2x2x1
jax: 0.10.0
libtpu: 0.0.40
codegen_flags: <defaults>
</compile_context>

<pallas_src>
import jax
import jax.numpy as jnp
from jax.experimental import pallas as pl
from jax.experimental.pallas import tpu as pltpu
import numpy as np


def _round_up(x, m):
    return ((x + m - 1) // m) * m


def _time_encoder_kernel(t_ref, tab_ref, out_ref):
    # t_ref:   (tb, 1)        per-sample time values
    # tab_ref: (2, dim_pad)   row 0: [inv_freq | inv_freq | 0-pad]
    #                         row 1: [0 ...    | pi/2 ... | 0-pad]
    # out_ref: (tb, dim_pad)  [sin(t*f) | cos(t*f)] via one sin(t*f + offs)
    phase = t_ref[...] * tab_ref[0:1, :] + tab_ref[1:2, :]   # (tb, dim_pad)
    out_ref[...] = jnp.sin(phase).astype(out_ref.dtype)      # single unmasked vst


def time_encoder_forward(t, dim, *, out_dtype=jnp.float32,
                         vmem_budget_bytes=8 << 20):
    """t: (B,) float time values -> (B, dim) sinusoidal embedding."""
    assert dim % 2 == 0, "dim must be even"
    f32 = jnp.float32
    B = t.shape[0]
    half = dim // 2
    dim_pad = max(128, _round_up(dim, 128))   # keep the store lane-dense

    # ---- host-side constant table (depends only on `dim`) -------------------
    inv_freq = 1.0 / (10000.0 ** (jnp.arange(0, dim, 2, dtype=f32) / dim))  # (half,)
    freq_row = jnp.concatenate([inv_freq, inv_freq])                        # (dim,)
    offs_row = jnp.concatenate([jnp.zeros((half,), f32),
                                jnp.full((half,), jnp.pi / 2.0, dtype=f32)])
    if dim_pad != dim:
        pad = dim_pad - dim
        freq_row = jnp.pad(freq_row, (0, pad))
        offs_row = jnp.pad(offs_row, (0, pad))
    tab = jnp.stack([freq_row, offs_row])                                    # (2, dim_pad)

    # ---- batch tiling: big sublane-aligned tiles under a VMEM budget --------
    b8 = max(8, _round_up(B, 8))
    # per-row VMEM: output row (dim_pad f32) + t row lane-padded to 128 lanes
    bytes_per_row = 4 * (dim_pad + 128)
    tb_cap = (vmem_budget_bytes // (2 * bytes_per_row) // 8) * 8   # x2 double buffers
    tb_cap = int(max(8, min(tb_cap, 1024)))
    tb = min(tb_cap, b8)
    if b8 >= 16 and b8 <= tb:
        # keep >=2 parallel grid steps so v7x can shard across both TensorCores
        tb = max(8, _round_up(pl.cdiv(b8, 2), 8))
    b_pad = _round_up(b8, tb)

    t2 = t.astype(f32).reshape(B, 1)
    if b_pad != B:
        t2 = jnp.pad(t2, ((0, b_pad - B), (0, 0)))

    grid = (b_pad // tb,)

    out = pl.pallas_call(
        _time_encoder_kernel,
        out_shape=jax.ShapeDtypeStruct((b_pad, dim_pad), out_dtype),
        grid_spec=pltpu.PrefetchScalarGridSpec(
            num_scalar_prefetch=0,
            grid=grid,
            in_specs=[
                pl.BlockSpec((tb, 1), lambda i: (i, 0)),        # t values
                pl.BlockSpec((2, dim_pad), lambda i: (0, 0)),   # freq/offset table
            ],
            out_specs=pl.BlockSpec((tb, dim_pad), lambda i: (i, 0)),
        ),
        compiler_params=pltpu.CompilerParams(
            dimension_semantics=("parallel",)),
    )(t2, tab)

    if b_pad != B or dim_pad != dim:
        out = out[:B, :dim]
    return out


# ---------------- pure-JAX reference (mirrors the PyTorch module) -----------
def reference_forward(t, dim):
    inv_freq = 1.0 / (10000.0 ** (jnp.arange(0, dim, 2, dtype=jnp.float32) / dim))
    tt = t.astype(jnp.float32)[:, None]                     # (B, 1)
    s = jnp.sin(tt * inv_freq)                              # (B, dim//2)
    c = jnp.cos(tt * inv_freq)                              # (B, dim//2)
    return jnp.concatenate([s, c], axis=-1)                 # (B, dim)


if __name__ == "__main__":
    B, dim = 10, 128            # exercises batch padding (10 -> 16) + 2-step grid
    key = jax.random.PRNGKey(0)
    t = jax.random.uniform(key, (B,), jnp.float32, minval=0.0, maxval=100.0)

    out = time_encoder_forward(t, dim)
    out = jax.block_until_ready(out)

    ref = reference_forward(t, dim)
    assert out.shape == ref.shape == (B, dim)
    np.testing.assert_allclose(np.asarray(out), np.asarray(ref),
                               atol=1e-4, rtol=1e-4)
    print("KERNEL_OK")
</pallas_src>

<mosaic_0001>
module attributes {stable_mosaic.version = 11 : i64} {
  func.func @_time_encoder_kernel(%arg0: i32, %arg1: memref<8x1xf32, #tpu.memory_space<vmem>>, %arg2: memref<2x128xf32, #tpu.memory_space<vmem>>, %arg3: memref<8x128xf32, #tpu.memory_space<vmem>>) attributes {dimension_semantics = [#tpu.dimension_semantics<parallel>], iteration_bounds = array<i64: 2>, scalar_prefetch = 0 : i64, scratch_operands = 0 : i64, tpu.core_type = #tpu.core_type<tc>, window_params = [{transform_indices = @transform_0, window_bounds = array<i64: 8, 1>}, {pipeline_mode = #tpu.pipeline_mode<synchronous>, transform_indices = @transform_1, window_bounds = array<i64: 2, 128>}, {transform_indices = @transform_2, window_bounds = array<i64: 8, 128>}]} {
    %c0 = arith.constant 0 : index
    %c0_0 = arith.constant 0 : index
    %0 = vector.load %arg1[%c0, %c0_0] : memref<8x1xf32, #tpu.memory_space<vmem>>, vector<8x1xf32>
    %c0_1 = arith.constant 0 : index
    %c0_2 = arith.constant 0 : index
    %1 = vector.load %arg2[%c0_1, %c0_2] : memref<2x128xf32, #tpu.memory_space<vmem>>, vector<1x128xf32>
    %2 = vector.broadcast %0 : vector<8x1xf32> to vector<8x128xf32>
    %3 = vector.broadcast %1 : vector<1x128xf32> to vector<8x128xf32>
    %4 = arith.mulf %2, %3 : vector<8x128xf32>
    %c1 = arith.constant 1 : index
    %c0_3 = arith.constant 0 : index
    %5 = vector.load %arg2[%c1, %c0_3] : memref<2x128xf32, #tpu.memory_space<vmem>>, vector<1x128xf32>
    %6 = vector.broadcast %5 : vector<1x128xf32> to vector<8x128xf32>
    %7 = arith.addf %4, %6 : vector<8x128xf32>
    %8 = math.sin %7 : vector<8x128xf32>
    %c0_4 = arith.constant 0 : index
    %c0_5 = arith.constant 0 : index
    %9 = vector.load %arg3[%c0_4, %c0_5] : memref<8x128xf32, #tpu.memory_space<vmem>>, vector<8x128xf32>
    tpu.vector_store %arg3[%c0_4, %c0_5], %8 {strides = array<i32>} : memref<8x128xf32, #tpu.memory_space<vmem>>, vector<8x128xf32>,
    return
  }
  func.func @transform_0(%arg0: i32) -> (i32, i32) {
    %c0_i32 = arith.constant 0 : i32
    %c0_i32_0 = arith.constant 0 : i32
    return %arg0, %c0_i32 : i32, i32
  }
  func.func @transform_1(%arg0: i32) -> (i32, i32) {
    %c0_i32 = arith.constant 0 : i32
    %c0_i32_0 = arith.constant 0 : i32
    %c0_i32_1 = arith.constant 0 : i32
    return %c0_i32, %c0_i32_0 : i32, i32
  }
  func.func @transform_2(%arg0: i32) -> (i32, i32) {
    %c0_i32 = arith.constant 0 : i32
    %c0_i32_0 = arith.constant 0 : i32
    return %arg0, %c0_i32 : i32, i32
  }
}

</mosaic_0001>

<bundles_post_ra>
// kernel: tpu_custom_call.1
= control target key start
LH: loop header
LB: loop body
LE: loop exit
PB: predicated region body
PF: predicated region fallthrough
CT: control target
= control target key end

     0   :  { %7 = vsyncpa [#allocation3], 0  ;;  %s620_s0 = inlined_call_operand.vmem [shape: f32[16,1], index: 0, kind: input, shape index: {}]   ;;  %s621_s1 = inlined_call_operand.vmem [shape: f32[2,128], index: 1, kind: input, shape index: {}]   ;;  %s622_s2 = inlined_call_operand.hbm [shape: f32[16,128], index: 2, kind: output, shape index: {}]  }
   0x1   :  { %9 = vsyncpa [#allocation3 + $0x1], 0  ;;  %s493_s9 = smov 0   ;;  %s495_s10 = smov 0  }
   0x2   :  { %s497_s11 = smov 0   ;;  %s499_s12 = smov 0  }
   0x3 LB: > { %s514_s13 = sadd.s32 4294967295, %s468_s12   ;;  %s335_s14 = sadd.s32 4294967294, %s468_s12   ;;  %s468_s12 = sphi %s499_s12, %s628_s12   ;;  %s464_s11 = sphi %s497_s11, %s627_s11   ;;  %s460_s10 = sphi %s495_s10, %s626_s10   ;;  %s456_s9 = sphi %s493_s9, %s625_s9  }
   0x4   : > { %s518_s15 = sadd.s32 1, %s468_s12   ;;  %s69_s16 = sadd.s32 1, %s464_s11 }
   0x5   : > { %s66_s17 = ssub.s32 %s468_s12, %s518_s15  ;;  %p79_p0 = scmp.ne.s32.totalorder %s464_s11, %s460_s10 }
   0x6   : > { %p67_p1 = scmp.eq.s32.totalorder %s66_s17, 0  ;;  %p80_p2 = scmp.eq.s32.totalorder %s514_s13, 1 }
   0x7   : > { %p85_p3 = scmp.ne.s32.totalorder %s460_s10, %s456_s9  ;;  %p86_p4 = scmp.eq.s32.totalorder %s335_s14, 1 }
   0x8   : > { %s529_s18 = scalar_select %p67_p1, %s464_s11, %s69_s16  }
   0x9   : > { %p531_p5 = por %p80_p2, %p79_p0  ;;  %p535_p6 = por %p86_p4, %p85_p3 }
   0xa   : > { %p338_p7 = scmp.ge.s32.totalorder %s468_s12, 1  ;;  %p114_p8 = scmp.lt.s32.totalorder %s468_s12, 3 }
   0xc   : > { %p115_p9 = pnand %p338_p7, %p114_p8 }
   0xd   : > { %p135_p10 = scmp.lt.s32.totalorder (!%p115_p9), %s514_s13, 1  ;;  %v470_v0 = vmov (!%p115_p9), 0   ;;  %v341_v2 = vld [vmem:[%s621_s1] ss:$0 sm:$0xff] (!%p115_p9)  ;;  %v342_v3 = vld [vmem:[%s621_s1 + $0x1] ss:$0 sm:$0xff] (!%p115_p9) }
   0xe   : > { %118 = sbr.rel (%p115_p9) target bundleno = 251 (0xfb), region = 28  ;;  %401 = vset.pattern.permute.xlu0 (!%p115_p9), %v470_v0  ;;  %v471_v17 = vmov (!%p115_p9), 683565275   ;;  %v472_v19 = vmov (!%p115_p9), 2475754826   ;;  %s132_s30 = sand.u32 (!%p115_p9), 1, %s460_s10  }
   0xf   : > { %v473_v22 = vmov (!%p115_p9), 2131351028   ;;  %v474_v25 = vmov (!%p115_p9), 2102212464   ;;  %v475_v28 = vmov (!%p115_p9), 920167782  }
  0x10   : > { %v476_v31 = vmov (!%p115_p9), 1326507024   ;;  %s339_s3 = sshll.u32 (!%p115_p9), %s132_s30, 3  ;;  %s348_s4 = sshll.u32 (!%p115_p9), %s514_s13, 7 }
  0x11   : > { %s134_s5 = scalar_lea.vmem (!%p115_p9), [#allocation2], %s339_s3  ;;  %s578_s14 = scalar_lea.hbm (!%p115_p9), %s622_s2, %s348_s4 }
  0x12   : > { %s276_s6 = sshll.u32 (!%p115_p9), %s134_s5, 4  ;;  %s477_s17 = smov (!%p115_p9), [#allocation2]   ;;  %s580_s6 = int_to_ptr.vmem [resolvable:$true] %s276_s6 }
  0x13   : > { %s406_s16 = scalar_lea.vmem (!%p115_p9), %s580_s6, 128 }
  0x14   : > { %p407_p11 = scmp.ne.s32.totalorder (!%p115_p9), %s580_s6, %s406_s16 }
  0x15   : > { %s136_s21 = scalar_select %p135_p10, %s514_s13, 1 }
  0x16   : > { %s263_s13 = scalar_lea.sflag [#allocation3], %s132_s30  ;;  %p408_p12 = pnand %p407_p11, %p531_p5 }
  0x17   : > { %s340_s22 = sshll.u32 %s136_s21, 3  ;;  %s410_s21 = sshll.u32 %s477_s17, 4  ;;  %s411_s21 = int_to_ptr.vmem [resolvable:$false] %s410_s21 }
  0x18   : > { %s138_s25 = scalar_lea.vmem %s620_s0, %s340_s22  ;;  %p409_p13 = pneg %p408_p12 }
  0x19   : > { %v139_v1 = vld [vmem:[%s138_s25] sm:$0xff]  ;;  %s412_s22 = scalar_lea.vmem %s411_s21, 256  ;;  %p413_p0 = scmp.lt.s32.totalorder %s580_s6, %s411_s21 }
  0x1a   : > { %143 = vperm.xlu0 %401, %v139_v1   ;;  %p414_p1 = scmp.lt.s32.totalorder %s412_s22, %s406_s16 }
  0x1c   : > { %p415_p2 = por %p414_p1, %p413_p0 }
  0x1e   : > { %p416_p3 = pnand %p415_p2, %p409_p13 }
  0x99   : > { %v144_v4 = vpop.permute.xlu0 %143 }
  0x9a   : > { %v150_v5 = vmul.f32 %v341_v2, %v144_v4 }
  0x9c   : > { %v552_v6 = vadd.f32 %v342_v3, %v150_v5 }
  0x9e   : > { %v160_v7 = vand.u32 2139095040, %v552_v6  ;;  %v157_v11 = vand.u32 2147483647, %v552_v6  ;;  %vm159_vm7 = vcmp.lt.s32.totalorder %v552_v6, 0  ;;  %vm249_vm12 = vweird.f32 %v552_v6 }
  0xa0   : > { %v161_v8 = vshrl.u32 %v160_v7, 23  ;;  %v164_v14 = vand.u32 8388607, %v157_v11  ;;  %vm158_vm8 = vcmp.le.f32.partialorder %v157_v11, 0.7853982 }
  0xa2   : > { %v343_v9 = vadd.s32 4294967169, %v161_v8  ;;  %v165_v33 = vor.u32 8388608, %v164_v14 }
  0xa4   : > { %v167_v10 = vadd.s32 1, %v343_v9  ;;  %v205_v47 = vshll.u32 %v165_v33, 8 }
  0xa6   : > { %vm168_vm0 = vcmp.gt.s32.totalorder %v167_v10, 0 }
  0xa7   : > { %v169_v12 = vsel %vm168_vm0, %v167_v10, 0 }
  0xa8   : > { %v171_v13 = vand.u32 31, %v169_v12  ;;  %v170_v16 = vshrl.u32 %v169_v12, 5 }
  0xaa   : > { %v172_v15 = vsub.s32 32, %v171_v13  ;;  %v174_v18 = vshll.u32 %v471_v17, %v171_v13  ;;  %v177_v20 = vshll.u32 %v472_v19, %v171_v13  ;;  %v180_v24 = vshll.u32 %v473_v22, %v171_v13 }
  0xab   : > { %v183_v27 = vshll.u32 %v474_v25, %v171_v13  ;;  %v186_v30 = vshll.u32 %v475_v28, %v171_v13  ;;  %vm189_vm1 = vcmp.lt.s32.totalorder %v170_v16, 1  ;;  %vm192_vm2 = vcmp.lt.s32.totalorder %v170_v16, 4 }
  0xac   : > { %v175_v21 = vshrl.u32 %v472_v19, %v172_v15  ;;  %v178_v23 = vshrl.u32 %v473_v22, %v172_v15  ;;  %v181_v26 = vshrl.u32 %v474_v25, %v172_v15  ;;  %v184_v29 = vshrl.u32 %v475_v28, %v172_v15 }
  0xad   : > { %v187_v32 = vshrl.u32 %v476_v31, %v172_v15  ;;  %v173_v42 = vshrl.u32 %v471_v17, %v172_v15  ;;  %vm191_vm3 = vcmp.lt.s32.totalorder %v170_v16, 3  ;;  %vm190_vm4 = vcmp.lt.s32.totalorder %v170_v16, 2 }
  0xae   : > { %v176_v34 = vor.u32 %v175_v21, %v174_v18  ;;  %v179_v35 = vor.u32 %v178_v23, %v177_v20  ;;  %v182_v36 = vor.u32 %v181_v26, %v180_v24  ;;  %v185_v37 = vor.u32 %v184_v29, %v183_v27 }
  0xaf   : > { %v188_v38 = vor.u32 %v187_v32, %v186_v30 }
  0xb0   : > { %v194_v39 = vsel %vm192_vm2, %v182_v36, 2102212464  ;;  %v197_v40 = vsel %vm189_vm1, %v176_v34, %v179_v35  ;;  %v201_v41 = vsel %vm189_vm1, %v179_v35, %v182_v36  ;;  %v198_v43 = vsel %vm192_vm2, %v185_v37, 920167782 }
  0xb1   : > { %v202_v44 = vsel %vm192_vm2, %v188_v38, 1326507024  ;;  %v199_v45 = vsel %vm191_vm3, %v182_v36, %v198_v43  ;;  %v193_v48 = vsel %vm189_vm1, %v173_v42, %v176_v34  ;;  %v195_v49 = vsel %vm191_vm3, %v179_v35, %v194_v39 }
  0xb2   : > { %v203_v46 = vsel %vm191_vm3, %v185_v37, %v202_v44  ;;  %v200_v50 = vsel %vm190_vm4, %v197_v40, %v199_v45  ;;  %v196_v56 = vsel %vm190_vm4, %v193_v48, %v195_v49 }
  0xb3   : > { %v204_v51 = vsel %vm190_vm4, %v201_v41, %v203_v46  ;;  %v561_v54 = vmul.u32.u64.low %v205_v47, %v200_v50  ;;  %v562_v55 = vmul.u32.u64.high %v205_v47, %v200_v50, %v561_v54  ;;  %v212_v58 = vmul.u32 %v205_v47, %v196_v56 }
  0xb4   : > { %v558_v52 = vmul.u32.u64.low %v205_v47, %v204_v51  ;;  %v559_v53 = vmul.u32.u64.high %v205_v47, %v204_v51, %v558_v52 }
  0xb5   : > { %v215_v57 = vadd.s32 1, %v562_v55 }
  0xb6   : > { %vm214_vm5 = vc.u32 %v559_v53, %v561_v54  ;;  %v213_v7 = vadd.s32 %v561_v54, %v559_v53 }
  0xb7   : > { %v216_v59 = vsel %vm214_vm5, %v215_v57, %v562_v55 }
  0xb8   : > { %v217_v60 = vadd.s32 %v216_v59, %v212_v58 }
  0xba   : > { %v218_v61 = vadd.s32 536870912, %v217_v60 }
  0xbc   : > { %v219_v62 = vshrl.u32 %v218_v61, 30 }
  0xbe   : > { %v220_v63 = vshll.u32 %v219_v62, 30  ;;  %v243_v20 = vsub.s32 4, %v219_v62 }
  0xc0   : > { %v221_v0 = vsub.s32 %v217_v60, %v220_v63  ;;  %v244_v23 = vsel %vm159_vm7, %v243_v20, %v219_v62 }
  0xc1   : > { %v246_v25 = vsel %vm158_vm8, 0, %v244_v23 }
  0xc2   : > { %v223_v1 = vsub.s32 0, %v221_v0  ;;  %v250_v26 = vadd.s32 3, %v246_v25 }
  0xc4   : > { %v344_v2 = vmin.u32 %v223_v1, %v221_v0  ;;  %v251_v27 = vand.u32 3, %v250_v26 }
  0xc6   : > { %v225_v3 = vclz %v344_v2  ;;  %vm256_vm9 = vcmp.eq.s32.totalorder %v251_v27, 2  ;;  %vm253_vm10 = vcmp.eq.s32.totalorder %v251_v27, 0  ;;  %vm252_vm11 = vcmp.lt.s32.totalorder %v251_v27, 2 }
  0xc8   : > { %v345_v4 = vadd.s32 4294967294, %v225_v3 }
  0xca   : > { %vm346_vm6 = vcmp.lt.s32.totalorder %v345_v4, 0 }
  0xcb   : > { %v228_v5 = vsel %vm346_vm6, 0, %v345_v4 }
  0xcc   : > { %v229_v8 = vsub.s32 32, %v228_v5  ;;  %v233_v9 = vsub.s32 4294967266, %v228_v5  ;;  %v230_v10 = vshll.u32 %v221_v0, %v228_v5 }
  0xce   : > { %v231_v12 = vshrl.u32 %v213_v7, %v229_v8  ;;  %v234_v13 = vadd.s32 127, %v233_v9 }
  0xd0   : > { %v232_v14 = vor.u32 %v231_v12, %v230_v10  ;;  %v235_v15 = vshll.u32 %v234_v13, 23 }
  0xd2   : > { %v236_v16 = vor.u32 4788187, %v235_v15  ;;  %v239_v18 = vcvt.s32.f32 %v232_v14 }
  0xd4   : > { %v237_v17 = vand.u32 2147483647, %v236_v16 }
  0xd6   : > { %v240_v19 = vmul.f32 %v239_v18, %v237_v17 }
  0xd8   : > { %v241_v21 = vxor.u32 2147483648, %v240_v19 }
  0xda   : > { %v242_v22 = vsel %vm159_vm7, %v241_v21, %v240_v19 }
  0xdb   : > { %v245_v24 = vsel %vm158_vm8, %v552_v6, %v242_v22 }
  0xdc   : > { %402 = vcosq.f32 %v245_v24 }
  0xdd   : > { %404 = vsinq.f32 %v245_v24 }
  0xe6   : > { %v403_v28 = vpop.eup %402 }
  0xe7   : > { %v405_v29 = vpop.eup %404  ;;  %v257_v30 = vxor.u32 2147483648, %v403_v28 }
  0xe8   : > { %v254_v31 = vxor.u32 2147483648, %v405_v29 }
  0xe9   : > { %v258_v11 = vsel %vm256_vm9, %v257_v30, %v405_v29 }
  0xea   : > { %v255_v32 = vsel %vm253_vm10, %v403_v28, %v254_v31 }
  0xeb   : > { %v259_v33 = vsel %vm252_vm11, %v255_v32, %v258_v11 }
  0xec   : > { %v260_v34 = vsel %vm249_vm12, nan, %v259_v33 }
  0xed   : > { %261 = vst [vmem:[%s134_s5] sm:$0xff] %v260_v34 }
  0xee   : > { %419 = shalt.err (!%p416_p3)
}
  0xef   : > { %s420_s23 = scalar_lea.hbm %s578_s14, 128  ;;  %s424_s26 = scalar_lea.hbm %s622_s2, 256 }
  0xf0   : > { %p421_p4 = scmp.ne.s32.totalorder %s578_s14, %s420_s23  ;;  %p425_p9 = scmp.lt.u32.totalorder %s578_s14, %s622_s2 }
  0xf1   : > { %p426_p10 = scmp.lt.u32.totalorder %s424_s26, %s420_s23  ;;  %p428_p12 = scmp.lt.u32.totalorder %s420_s23, %s578_s14 }
  0xf2   : > { %p422_p7 = pnand %p421_p4, %p531_p5 }
  0xf3   : > { %p427_p11 = por %p426_p10, %p425_p9 }
  0xf4   : > { %p423_p8 = pneg %p422_p7 }
  0xf5   : > { %p429_p13 = por %p428_p12, %p427_p11 }
  0xf7   : > { %p430_p0 = pnand %p429_p13, %p423_p8 }
  0xf9   : > { %433 = shalt.err (!%p430_p0)
}
  0xfa   : > { %355 = dma.vmem_to_hbm [thread:$0]  (%p531_p5), %s580_s6, 128, %s578_s14, %s263_s13  }
  0xfb PF: > { %p361_p1 = scmp.ge.s32.totalorder %s468_s12, 2  ;;  %s288_s29 = sand.u32 1, %s456_s9  }
  0xfc   : > { %s289_s30 = scalar_lea.sflag [#allocation3], %s288_s29 }
  0xfd   : > { %p358_p2 = pnand %p361_p1, %p535_p6 }
  0xff   : > { %451 = dma.done.wait (!%p358_p2), %s289_s30, 128  }
 0x100   : > { %453 = vsyncadd (!%p358_p2), %s289_s30, 4294967168  ;;  %p12_p3 = scmp.ge.s32.totalorder %s518_s15, 4   ;;  %s625_s9 = smov %s460_s10 }
 0x101   : > { %s626_s10 = smov %s464_s11  ;;  %s627_s11 = smov %s529_s18 }
 0x102   : > { %s628_s12 = smov %s518_s15  ;;  %14 = sbr.rel (!%p12_p3) target bundleno = 3 (0x3), region = 63 }
 0x109   :  { %294 = vsyncpa [#allocation3], 1 }
 0x10a   :  { %296 = vsyncpa [#allocation3 + $0x1], 1 }

</bundles_post_ra>
